<compile_context>
chip_gen: v7x
topology: tpu7x:2x2x1
jax: 0.10.0
libtpu: 0.0.40
codegen_flags: <defaults>
</compile_context>

<pallas_src>
import functools

import jax
import jax.numpy as jnp
from jax import lax
from jax.experimental import pallas as pl
from jax.experimental.pallas import tpu as pltpu

EPS = 1e-5


def _row_offset_groups(k, stride):
    """Conv#0 taps grouped by which stride-grouped output-position offset r they read."""
    pad1 = (k - 1) // 2
    r_min = (-pad1) // stride              # floor division
    r_max = (k - 1 - pad1) // stride
    return pad1, r_min, r_max


def _pick_batch_tile(B, l_out):
    """Smallest batch slice whose q_tile = bt*l_out is 128-aligned (prefer >= 512 lanes)."""
    divisors = [d for d in range(1, B + 1) if B % d == 0]
    valid = [d for d in divisors if (d * l_out) % 128 == 0]
    if not valid:
        return B                           # tiny problem: single grid step, full batch
    big = [d for d in valid if d * l_out >= 512]
    return big[0] if big else valid[0]


# ----------------------------------------------------------------------------- kernel
def _make_kernel(l_out, c_out, k, pad2, r_list, q_tile):
    use_xlu = (q_tile % 128 == 0)          # lane rolls -> XLU; tiny shapes fall back

    def lane_shift(v, d):
        # result[:, q] = v[:, q + d]  (wrap-around entries are zeroed by the caller's mask)
        if d == 0:
            return v
        if use_xlu:
            return pltpu.roll(v, (-d) % q_tile, axis=1)
        return jnp.roll(v, -d, axis=1)

    def kernel(x_ref, w0_ref, b0_ref, w2_ref, b2_ref, o_ref):
        xg = x_ref[...]                                            # (s*c_in, q_tile), lane-major q
        # position of each lane inside its batch item (grid steps start at batch boundaries)
        pos = lax.broadcasted_iota(jnp.int32, (1, q_tile), 1) % l_out

        # ---- conv#0 (stride = subsample_length) + fused 1x1 strided shortcut -----------
        # one wide-K matmul: shifted/masked views concatenated along the contraction axis.
        xs = []
        for r in r_list:
            v = lane_shift(xg, r)
            if r != 0:
                valid = (pos + r >= 0) & (pos + r < l_out)         # 'same' zero padding
                v = jnp.where(valid, v, jnp.zeros((), v.dtype))
            xs.append(v)
        x_cat = xs[0] if len(xs) == 1 else jnp.concatenate(xs, axis=0)
        acc0 = jnp.dot(w0_ref[...], x_cat,                         # (2*c_out, q_tile)
                       preferred_element_type=jnp.float32)
        acc0 = acc0 + b0_ref[...]                                  # folded conv-bias + BN bias
        h = jnp.maximum(acc0[:c_out, :], 0.0)                      # main stream, post-ReLU
        ident = acc0[c_out:, :]                                    # shortcut branch (Conv-BN)

        # ---- conv#1 (stride 1, 'same' padding): one wide-K matmul over all k taps -------
        h_lo = h.astype(w2_ref.dtype)                              # single cast before the taps
        hs = []
        for j in range(k):
            d = j - pad2
            v = lane_shift(h_lo, d)
            if d != 0:
                valid = (pos + d >= 0) & (pos + d < l_out)
                v = jnp.where(valid, v, jnp.zeros((), v.dtype))
            hs.append(v)
        h_cat = hs[0] if len(hs) == 1 else jnp.concatenate(hs, axis=0)
        acc1 = jnp.dot(w2_ref[...], h_cat,                         # (c_out, q_tile)
                       preferred_element_type=jnp.float32)

        # ---- residual add + output activation; channels-major (lane-dense) store --------
        o_ref[...] = jnp.maximum(acc1 + b2_ref[...] + ident, 0.0).astype(o_ref.dtype)

    return kernel


# ----------------------------------------------------------------------------- wrapper
def resnet_basic_block(x, fp, *, kernel_size, stride, batch_tile=None,
                       compute_dtype=jnp.float32, vmem_limit_bytes=None):
    """x: (B, C_in, L) float32 (PyTorch NCL). Returns (B, C_out, L_out)."""
    B, c_in, L = x.shape
    k, s = kernel_size, stride
    c_out = fp["b2"].shape[0]
    pad1, r_min, r_max = _row_offset_groups(k, s)
    pad2 = (k - 1) // 2
    r_list = list(range(r_min, r_max + 1))
    n_r = len(r_list)

    assert L % s == 0, "subsample_length must divide the sequence length"
    l_out = (L + 2 * pad1 - k) // s + 1
    assert l_out == L // s and l_out >= k
    assert c_out % 8 == 0, "c_out must be a multiple of 8 (sublane split of fused shortcut rows)"

    bt = batch_tile if batch_tile is not None else _pick_batch_tile(B, l_out)
    assert B % bt == 0
    nb = B // bt
    q_tile = bt * l_out
    # if the grid has more than one step the lane tiles must stay 128-aligned
    assert nb == 1 or q_tile % 128 == 0, "pick batch_tile so batch_tile*l_out % 128 == 0"

    # ---- glue: lane-major activations (s*c_in, B*l_out); q = batch*length on the lane axis.
    #      No im2col, no padding copy, no separate shortcut stream.  When chaining blocks,
    #      keep activations in this layout / the kernel's (c_out, q) output layout instead. ----
    xg = (x.reshape(B, c_in, l_out, s)
            .transpose(3, 1, 0, 2)
            .reshape(s * c_in, B * l_out)
            .astype(compute_dtype))

    itemsize = jnp.dtype(compute_dtype).itemsize
    if vmem_limit_bytes is None:
        in_bytes = q_tile * s * c_in * itemsize
        out_bytes = c_out * q_tile * 4
        w_bytes = (2 * c_out * n_r * s * c_in + c_out * k * c_out) * itemsize + 3 * c_out * 4
        live = (2 * c_out + (k + 2) * c_out) * q_tile * 4 + n_r * in_bytes
        vmem_limit_bytes = int(min(max(2 * (in_bytes + out_bytes) + 2 * w_bytes + live
                                       + (4 << 20), 32 << 20), 64 << 20))

    kernel = _make_kernel(l_out, c_out, k, pad2, r_list, q_tile)

    out = pl.pallas_call(
        kernel,
        out_shape=jax.ShapeDtypeStruct((c_out, B * l_out), jnp.float32),
        grid_spec=pltpu.PrefetchScalarGridSpec(
            num_scalar_prefetch=0,
            grid=(nb,),
            in_specs=[
                pl.BlockSpec((s * c_in, q_tile), lambda t: (0, t)),            # activations
                pl.BlockSpec((2 * c_out, n_r * s * c_in), lambda t: (0, 0)),   # conv#0+sc W (flat)
                pl.BlockSpec((2 * c_out, 1), lambda t: (0, 0)),                # conv#0+sc bias
                pl.BlockSpec((c_out, k * c_out), lambda t: (0, 0)),            # conv#1 W (flat)
                pl.BlockSpec((c_out, 1), lambda t: (0, 0)),                    # conv#1 bias
            ],
            out_specs=pl.BlockSpec((c_out, q_tile), lambda t: (0, t)),
        ),
        compiler_params=pltpu.CompilerParams(
            dimension_semantics=("parallel",),
            vmem_limit_bytes=vmem_limit_bytes),
    )(xg,
      fp["w0f"].astype(compute_dtype), fp["b0"],
      fp["w2f"].astype(compute_dtype), fp["b2"])

    return out.reshape(c_out, B, l_out).transpose(1, 0, 2)                     # back to NCL


# ----------------------------------------------------------------------------- params
def make_raw_params(key, c_in, c_out, k):
    ks = iter(jax.random.split(key, 24))

    def conv_w(kk, o, i, kw):
        return jax.random.normal(kk, (o, i, kw), jnp.float32) / jnp.sqrt(i * kw)

    def bn(k1, k2, k3, k4, c):
        gamma = 1.0 + 0.1 * jax.random.normal(k1, (c,), jnp.float32)
        beta = 0.1 * jax.random.normal(k2, (c,), jnp.float32)
        mean = 0.1 * jax.random.normal(k3, (c,), jnp.float32)
        var = jnp.abs(jax.random.normal(k4, (c,), jnp.float32)) + 0.5
        return gamma, beta, mean, var

    return {
        "W1": conv_w(next(ks), c_out, c_in, k),
        "bc1": 0.1 * jax.random.normal(next(ks), (c_out,), jnp.float32),
        "bn1": bn(next(ks), next(ks), next(ks), next(ks), c_out),
        "W2": conv_w(next(ks), c_out, c_out, k),
        "bc2": 0.1 * jax.random.normal(next(ks), (c_out,), jnp.float32),
        "bn2": bn(next(ks), next(ks), next(ks), next(ks), c_out),
        "Wsc": conv_w(next(ks), c_out, c_in, 1),
        "bcsc": 0.1 * jax.random.normal(next(ks), (c_out,), jnp.float32),
        "bnsc": bn(next(ks), next(ks), next(ks), next(ks), c_out),
    }


def fold_params(raw, c_in, c_out, k, stride):
    """Fold conv-bias + BN into weights/biases; group conv#0 taps by output-position offset r,
    append the 1x1 shortcut as extra output rows of conv#0, and flatten both convs' weights
    to wide-K (M, K_total) matrices matching the kernel's concatenated operands."""
    s = stride
    pad1, r_min, r_max = _row_offset_groups(k, s)
    n_r = r_max - r_min + 1

    def fold(bnp, conv_bias):
        gamma, beta, mean, var = bnp
        scale = gamma / jnp.sqrt(var + EPS)
        bias = beta + (conv_bias - mean) * scale
        return scale, bias

    s1, b1 = fold(raw["bn1"], raw["bc1"])
    s2, b2 = fold(raw["bn2"], raw["bc2"])
    ssc, bsc = fold(raw["bnsc"], raw["bcsc"])

    # conv#0: BN-scaled weights grouped by offset r; rows [c_out:2*c_out) carry the fused
    # 1x1 strided shortcut (r == 0, u == 0).
    w1s = raw["W1"] * s1[:, None, None]                      # (c_out, c_in, k)
    w0g = jnp.zeros((n_r, 2 * c_out, s * c_in), jnp.float32)
    for j in range(k):
        d = j - pad1
        r = d // s                                           # floor
        u = d - r * s                                        # in [0, s)
        w0g = w0g.at[r - r_min, :c_out, u * c_in:(u + 1) * c_in].set(w1s[:, :, j])
    wscs = raw["Wsc"][:, :, 0] * ssc[:, None]                # (c_out, c_in)
    w0g = w0g.at[-r_min, c_out:, :c_in].set(wscs)
    w0f = jnp.transpose(w0g, (1, 0, 2)).reshape(2 * c_out, n_r * s * c_in)

    w2s = raw["W2"] * s2[:, None, None]                      # (c_out, c_out_in, k)
    w2f = jnp.transpose(w2s, (0, 2, 1)).reshape(c_out, k * c_out)

    return {
        "w0f": w0f,
        "b0": jnp.concatenate([b1, bsc]).reshape(2 * c_out, 1),
        "w2f": w2f,
        "b2": b2.reshape(c_out, 1),
    }


# ----------------------------------------------------------------------------- pure-JAX reference
def ref_forward(x, raw, *, kernel_size, stride):
    k = kernel_size
    pad = (k - 1) // 2

    def cbn(x, W, bc, bnp, s, p, act):
        gamma, beta, mean, var = bnp
        y = lax.conv_general_dilated(x, W, window_strides=(s,), padding=[(p, p)],
                                     dimension_numbers=("NCH", "OIH", "NCH"))
        y = y + bc[None, :, None]
        y = ((y - mean[None, :, None]) / jnp.sqrt(var + EPS)[None, :, None]
             * gamma[None, :, None] + beta[None, :, None])
        if act:
            y = jnp.maximum(y, 0.0)
        return y

    h = cbn(x, raw["W1"], raw["bc1"], raw["bn1"], stride, pad, True)
    y = cbn(h, raw["W2"], raw["bc2"], raw["bn2"], 1, pad, False)
    ident = cbn(x, raw["Wsc"], raw["bcsc"], raw["bnsc"], stride, 0, False)
    return jnp.maximum(y + ident, 0.0)


# ----------------------------------------------------------------------------- main
if __name__ == "__main__":
    B, C_IN, L = 8, 4, 64
    C_OUT, K, STRIDE = 8, 3, 2     # num_filters, filter_length, subsample_length

    key = jax.random.PRNGKey(0)
    kx, kp = jax.random.split(key)
    x = jax.random.normal(kx, (B, C_IN, L), jnp.float32)

    raw = make_raw_params(kp, C_IN, C_OUT, K)
    fp = fold_params(raw, C_IN, C_OUT, K, STRIDE)

    run = jax.jit(functools.partial(resnet_basic_block, kernel_size=K, stride=STRIDE))
    out = jax.block_until_ready(run(x, fp))

    ref = ref_forward(x, raw, kernel_size=K, stride=STRIDE)
    assert out.shape == ref.shape, (out.shape, ref.shape)
    assert jnp.allclose(out, ref, rtol=1e-4, atol=1e-4), float(jnp.max(jnp.abs(out - ref)))

    print("KERNEL_OK")
</pallas_src>

<mosaic_0001>
module attributes {stable_mosaic.version = 11 : i64} {
  func.func @kernel(%arg0: i32, %arg1: memref<8x128xf32, #tpu.memory_space<vmem>>, %arg2: memref<16x16xf32, #tpu.memory_space<vmem>>, %arg3: memref<16x1xf32, #tpu.memory_space<vmem>>, %arg4: memref<8x24xf32, #tpu.memory_space<vmem>>, %arg5: memref<8x1xf32, #tpu.memory_space<vmem>>, %arg6: memref<8x128xf32, #tpu.memory_space<vmem>>) attributes {dimension_semantics = [#tpu.dimension_semantics<parallel>], iteration_bounds = array<i64: 2>, scalar_prefetch = 0 : i64, scratch_operands = 0 : i64, tpu.core_type = #tpu.core_type<tc>, window_params = [{transform_indices = @transform_0, window_bounds = array<i64: 8, 128>}, {pipeline_mode = #tpu.pipeline_mode<synchronous>, transform_indices = @transform_1, window_bounds = array<i64: 16, 16>}, {pipeline_mode = #tpu.pipeline_mode<synchronous>, transform_indices = @transform_2, window_bounds = array<i64: 16, 1>}, {pipeline_mode = #tpu.pipeline_mode<synchronous>, transform_indices = @transform_3, window_bounds = array<i64: 8, 24>}, {pipeline_mode = #tpu.pipeline_mode<synchronous>, transform_indices = @transform_4, window_bounds = array<i64: 8, 1>}, {transform_indices = @transform_5, window_bounds = array<i64: 8, 128>}]} {
    %c0 = arith.constant 0 : index
    %c0_0 = arith.constant 0 : index
    %0 = vector.load %arg1[%c0, %c0_0] : memref<8x128xf32, #tpu.memory_space<vmem>>, vector<8x128xf32>
    %1 = tpu.iota {dimensions = array<i32: 1>} : vector<1x128xi32>
    %c32_i32 = arith.constant 32 : i32
    %c0_i32 = arith.constant 0 : i32
    %2 = arith.cmpi eq, %c32_i32, %c0_i32 : i32
    %c1_i32 = arith.constant 1 : i32
    %3 = arith.select %2, %c1_i32, %c32_i32 : i32
    %4 = vector.broadcast %3 : i32 to vector<1x128xi32>
    %5 = arith.remsi %1, %4 : vector<1x128xi32>
    %c0_i32_1 = arith.constant 0 : i32
    %6 = vector.broadcast %c0_i32_1 : i32 to vector<1x128xi32>
    %7 = arith.cmpi ne, %5, %6 : vector<1x128xi32>
    %c0_i32_2 = arith.constant 0 : i32
    %8 = vector.broadcast %c0_i32_2 : i32 to vector<1x128xi32>
    %9 = arith.cmpi slt, %5, %8 : vector<1x128xi32>
    %c0_i32_3 = arith.constant 0 : i32
    %10 = arith.cmpi slt, %3, %c0_i32_3 : i32
    %11 = vector.broadcast %10 : i1 to vector<1x128xi1>
    %12 = vector.broadcast %11 : vector<1x128xi1> to vector<1x128xi1>
    %13 = arith.xori %9, %12 : vector<1x128xi1>
    %14 = arith.andi %13, %7 : vector<1x128xi1>
    %15 = vector.broadcast %3 : i32 to vector<1x128xi32>
    %16 = arith.addi %5, %15 : vector<1x128xi32>
    %17 = arith.select %14, %16, %5 : vector<1x128xi1>, vector<1x128xi32>
    %c1_i32_4 = arith.constant 1 : i32
    %18 = tpu.dynamic_rotate %0 by %c1_i32_4 dim 1 : vector<8x128xf32>, i32 -> vector<8x128xf32>
    %c-1_i32 = arith.constant -1 : i32
    %19 = vector.broadcast %c-1_i32 : i32 to vector<1x128xi32>
    %20 = arith.addi %17, %19 : vector<1x128xi32>
    %c0_i32_5 = arith.constant 0 : i32
    %21 = vector.broadcast %c0_i32_5 : i32 to vector<1x128xi32>
    %22 = arith.cmpi sge, %20, %21 : vector<1x128xi32>
    %c-1_i32_6 = arith.constant -1 : i32
    %23 = vector.broadcast %c-1_i32_6 : i32 to vector<1x128xi32>
    %24 = arith.addi %17, %23 : vector<1x128xi32>
    %c32_i32_7 = arith.constant 32 : i32
    %25 = vector.broadcast %c32_i32_7 : i32 to vector<1x128xi32>
    %26 = arith.cmpi slt, %24, %25 : vector<1x128xi32>
    %27 = arith.andi %22, %26 : vector<1x128xi1>
    %cst = arith.constant 0.000000e+00 : f32
    %28 = vector.shape_cast %27 : vector<1x128xi1> to vector<1x128xi1>
    %29 = vector.broadcast %28 : vector<1x128xi1> to vector<8x128xi1>
    %30 = vector.broadcast %cst : f32 to vector<8x128xf32>
    %31 = arith.select %29, %18, %30 : vector<8x128xi1>, vector<8x128xf32>
    %32 = tpu.concatenate %31, %0 in 0 : vector<8x128xf32>, vector<8x128xf32> -> vector<16x128xf32>
    %c0_8 = arith.constant 0 : index
    %c0_9 = arith.constant 0 : index
    %33 = vector.load %arg2[%c0_8, %c0_9] : memref<16x16xf32, #tpu.memory_space<vmem>>, vector<16x16xf32>
    %cst_10 = arith.constant dense<0.000000e+00> : vector<16x128xf32>
    %34 = tpu.matmul %33, %32, %cst_10 {dimension_numbers = #tpu.dot_dimension_numbers<[1], [0], [0], [1], [0, 0, 1, 1], [], []>} : vector<16x16xf32>, vector<16x128xf32>, vector<16x128xf32> -> vector<16x128xf32>
    %c0_11 = arith.constant 0 : index
    %c0_12 = arith.constant 0 : index
    %35 = vector.load %arg3[%c0_11, %c0_12] : memref<16x1xf32, #tpu.memory_space<vmem>>, vector<16x1xf32>
    %36 = vector.broadcast %35 : vector<16x1xf32> to vector<16x128xf32>
    %37 = arith.addf %34, %36 : vector<16x128xf32>
    %38 = vector.extract_strided_slice %37 {offsets = [0, 0], sizes = [8, 128], strides = [1, 1]} : vector<16x128xf32> to vector<8x128xf32>
    %cst_13 = arith.constant 0.000000e+00 : f32
    %39 = vector.broadcast %cst_13 : f32 to vector<8x128xf32>
    %40 = arith.maximumf %38, %39 : vector<8x128xf32>
    %41 = vector.extract_strided_slice %37 {offsets = [8, 0], sizes = [8, 128], strides = [1, 1]} : vector<16x128xf32> to vector<8x128xf32>
    %c1_i32_14 = arith.constant 1 : i32
    %42 = tpu.dynamic_rotate %40 by %c1_i32_14 dim 1 : vector<8x128xf32>, i32 -> vector<8x128xf32>
    %c-1_i32_15 = arith.constant -1 : i32
    %43 = vector.broadcast %c-1_i32_15 : i32 to vector<1x128xi32>
    %44 = arith.addi %17, %43 : vector<1x128xi32>
    %c0_i32_16 = arith.constant 0 : i32
    %45 = vector.broadcast %c0_i32_16 : i32 to vector<1x128xi32>
    %46 = arith.cmpi sge, %44, %45 : vector<1x128xi32>
    %c-1_i32_17 = arith.constant -1 : i32
    %47 = vector.broadcast %c-1_i32_17 : i32 to vector<1x128xi32>
    %48 = arith.addi %17, %47 : vector<1x128xi32>
    %c32_i32_18 = arith.constant 32 : i32
    %49 = vector.broadcast %c32_i32_18 : i32 to vector<1x128xi32>
    %50 = arith.cmpi slt, %48, %49 : vector<1x128xi32>
    %51 = arith.andi %46, %50 : vector<1x128xi1>
    %cst_19 = arith.constant 0.000000e+00 : f32
    %52 = vector.shape_cast %51 : vector<1x128xi1> to vector<1x128xi1>
    %53 = vector.broadcast %52 : vector<1x128xi1> to vector<8x128xi1>
    %54 = vector.broadcast %cst_19 : f32 to vector<8x128xf32>
    %55 = arith.select %53, %42, %54 : vector<8x128xi1>, vector<8x128xf32>
    %c127_i32 = arith.constant 127 : i32
    %56 = tpu.dynamic_rotate %40 by %c127_i32 dim 1 : vector<8x128xf32>, i32 -> vector<8x128xf32>
    %c1_i32_20 = arith.constant 1 : i32
    %57 = vector.broadcast %c1_i32_20 : i32 to vector<1x128xi32>
    %58 = arith.addi %17, %57 : vector<1x128xi32>
    %c0_i32_21 = arith.constant 0 : i32
    %59 = vector.broadcast %c0_i32_21 : i32 to vector<1x128xi32>
    %60 = arith.cmpi sge, %58, %59 : vector<1x128xi32>
    %c1_i32_22 = arith.constant 1 : i32
    %61 = vector.broadcast %c1_i32_22 : i32 to vector<1x128xi32>
    %62 = arith.addi %17, %61 : vector<1x128xi32>
    %c32_i32_23 = arith.constant 32 : i32
    %63 = vector.broadcast %c32_i32_23 : i32 to vector<1x128xi32>
    %64 = arith.cmpi slt, %62, %63 : vector<1x128xi32>
    %65 = arith.andi %60, %64 : vector<1x128xi1>
    %cst_24 = arith.constant 0.000000e+00 : f32
    %66 = vector.shape_cast %65 : vector<1x128xi1> to vector<1x128xi1>
    %67 = vector.broadcast %66 : vector<1x128xi1> to vector<8x128xi1>
    %68 = vector.broadcast %cst_24 : f32 to vector<8x128xf32>
    %69 = arith.select %67, %56, %68 : vector<8x128xi1>, vector<8x128xf32>
    %70 = tpu.concatenate %55, %40, %69 in 0 : vector<8x128xf32>, vector<8x128xf32>, vector<8x128xf32> -> vector<24x128xf32>
    %c0_25 = arith.constant 0 : index
    %c0_26 = arith.constant 0 : index
    %71 = vector.load %arg4[%c0_25, %c0_26] : memref<8x24xf32, #tpu.memory_space<vmem>>, vector<8x24xf32>
    %cst_27 = arith.constant dense<0.000000e+00> : vector<8x128xf32>
    %72 = tpu.matmul %71, %70, %cst_27 {dimension_numbers = #tpu.dot_dimension_numbers<[1], [0], [0], [1], [0, 0, 1, 1], [], []>} : vector<8x24xf32>, vector<24x128xf32>, vector<8x128xf32> -> vector<8x128xf32>
    %c0_28 = arith.constant 0 : index
    %c0_29 = arith.constant 0 : index
    %73 = vector.load %arg5[%c0_28, %c0_29] : memref<8x1xf32, #tpu.memory_space<vmem>>, vector<8x1xf32>
    %74 = vector.broadcast %73 : vector<8x1xf32> to vector<8x128xf32>
    %75 = arith.addf %72, %74 : vector<8x128xf32>
    %76 = arith.addf %75, %41 : vector<8x128xf32>
    %cst_30 = arith.constant 0.000000e+00 : f32
    %77 = vector.broadcast %cst_30 : f32 to vector<8x128xf32>
    %78 = arith.maximumf %76, %77 : vector<8x128xf32>
    %c0_31 = arith.constant 0 : index
    %c0_32 = arith.constant 0 : index
    %79 = vector.load %arg6[%c0_31, %c0_32] : memref<8x128xf32, #tpu.memory_space<vmem>>, vector<8x128xf32>
    tpu.vector_store %arg6[%c0_31, %c0_32], %78 {strides = array<i32>} : memref<8x128xf32, #tpu.memory_space<vmem>>, vector<8x128xf32>,
    return
  }
  func.func @transform_0(%arg0: i32) -> (i32, i32) {
    %c0_i32 = arith.constant 0 : i32
    %c0_i32_0 = arith.constant 0 : i32
    return %c0_i32, %arg0 : i32, i32
  }
  func.func @transform_1(%arg0: i32) -> (i32, i32) {
    %c0_i32 = arith.constant 0 : i32
    %c0_i32_0 = arith.constant 0 : i32
    %c0_i32_1 = arith.constant 0 : i32
    return %c0_i32, %c0_i32_0 : i32, i32
  }
  func.func @transform_2(%arg0: i32) -> (i32, i32) {
    %c0_i32 = arith.constant 0 : i32
    %c0_i32_0 = arith.constant 0 : i32
    %c0_i32_1 = arith.constant 0 : i32
    return %c0_i32, %c0_i32_0 : i32, i32
  }
  func.func @transform_3(%arg0: i32) -> (i32, i32) {
    %c0_i32 = arith.constant 0 : i32
    %c0_i32_0 = arith.constant 0 : i32
    %c0_i32_1 = arith.constant 0 : i32
    return %c0_i32, %c0_i32_0 : i32, i32
  }
  func.func @transform_4(%arg0: i32) -> (i32, i32) {
    %c0_i32 = arith.constant 0 : i32
    %c0_i32_0 = arith.constant 0 : i32
    %c0_i32_1 = arith.constant 0 : i32
    return %c0_i32, %c0_i32_0 : i32, i32
  }
  func.func @transform_5(%arg0: i32) -> (i32, i32) {
    %c0_i32 = arith.constant 0 : i32
    %c0_i32_0 = arith.constant 0 : i32
    return %c0_i32, %arg0 : i32, i32
  }
}

</mosaic_0001>

<bundles_post_ra>
// kernel: resnet_basic_block.1
= control target key start
LH: loop header
LB: loop body
LE: loop exit
PB: predicated region body
PF: predicated region fallthrough
CT: control target
= control target key end

     0   :  { %s601_s18 = smov 0   ;;  %s655_s0 = inlined_call_operand.vmem [shape: f32[8,256], index: 0, kind: input, shape index: {}]   ;;  %s656_s1 = inlined_call_operand.vmem [shape: f32[16,16], index: 1, kind: input, shape index: {}]   ;;  %s657_s2 = inlined_call_operand.vmem [shape: f32[16,1], index: 2, kind: input, shape index: {}]   ;;  %s658_s3 = inlined_call_operand.vmem [shape: f32[8,24], index: 3, kind: input, shape index: {}]   ;;  %s659_s4 = inlined_call_operand.vmem [shape: f32[8,1], index: 4, kind: input, shape index: {}]   ;;  %s660_s5 = inlined_call_operand.vmem [shape: f32[8,256], index: 5, kind: output, shape index: {}]  }
   0x1 LB: > { %s490_s19 = sadd.s32 4294967295, %s562_s18   ;;  %p494_p0 = scmp.ge.s32.totalorder %s562_s18, 1  ;;  %s562_s18 = sphi %s601_s18, %s15_s18  }
   0x2   : > { %p186_p1 = scmp.lt.s32.totalorder %s562_s18, 3 }
   0x4   : > { %p187_p2 = pnand %p494_p0, %p186_p1 }
   0x5   : > { %p212_p3 = scmp.lt.s32.totalorder (!%p187_p2), %s490_s19, 1  ;;  %v244_v0 = vld [vmem:[%s656_s1] sm:$0xff] (!%p187_p2)  ;;  %vm258_vm0 = vcmask (!%p187_p2), 130048   ;;  %v564_v1 = vmov (!%p187_p2), 0   ;;  %s565_s26 = smov (!%p187_p2), 1   ;;  %v221_v5 = vlaneseq (!%p187_p2)  ;;  %vm566_vm2 = vmmov (!%p187_p2), 1  }
   0x6   : > { %190 = sbr.rel (%p187_p2) target bundleno = 696 (0x2b8), region = 40  ;;  %517 = vmatprep.mubr.msk.f32.mxu0 (!%p187_p2), %vm258_vm0, %v244_v0  ;;  %554 = vset.pattern.permute.xlu0 (!%p187_p2), %v564_v1  ;;  %v246_v3 = vld [vmem:[%s657_s2] sm:$0xff] (!%p187_p2)  ;;  %v245_v12 = vld [vmem:[%s656_s1 + $0x8] sm:$0xff] (!%p187_p2)  ;;  %v567_v13 = vmov (!%p187_p2), 0.0|0.0   ;;  %vm568_vm4 = vmmov (!%p187_p2), 0   ;;  %v569_v14 = vmov (!%p187_p2), 0.0  }
   0x7   : > { %555 = vset.pattern.permute.xlu1 (!%p187_p2), %v564_v1  ;;  %v354_v4 = vld [vmem:[%s659_s4] sm:$0xff] (!%p187_p2)  ;;  %v222_v6 = vand.u32 (!%p187_p2), 127, %v221_v5  ;;  %535 = vmatprep.subr.bf16.mxu1 (!%p187_p2), %v567_v13  ;;  %s570_s8 = smov (!%p187_p2), 127   ;;  %v247_v20 = vld [vmem:[%s657_s2 + $0x8] sm:$0xff] (!%p187_p2)  ;;  %vm360_vm6 = vcmask (!%p187_p2), 195584  }
   0x8   : > { %526 = vmatprep.mubr.msk.f32.mxu1 (!%p187_p2), %vm568_vm4, %v569_v14  ;;  %v353_v24 = vld [vmem:[%s658_s3] sm:$0xff] (!%p187_p2) }
   0x9   : > { %v227_v7 = vand.u32 (!%p187_p2), 31, %v222_v6 }
   0xb   : > { %v237_v8 = vadd.s32 (!%p187_p2), 4294967295, %v227_v7  ;;  %v346_v22 = vadd.s32 (!%p187_p2), 1, %v227_v7 }
   0xd   : > { %s664_s19 = smov (!%p212_p3, %s490_s19), 1  ;;  %vm238_vm1 = vcmp.ge.s32.totalorder %v237_v8, 0  ;;  %vm348_vm5 = vcmp.lt.s32.totalorder %v346_v22, 32 }
   0xe   : > { %s495_s22 = sshll.u32 %s664_s19, 3  ;;  %vm627_vm3 = vmpackc.low %vm566_vm2, %vm238_vm1 }
   0xf   : > { %s215_s25 = scalar_lea.vmem %s655_s0, %s495_s22  ;;  %s219_s15 = scalar_lea.vmem %s660_s5, %s495_s22 }
  0x10   : > { %v220_v2 = vld [vmem:[%s215_s25] sm:$0xff] }
  0x11   : > { %235 = vrot.lane.b32.xlu0 %v220_v2, %s565_s26 }
  0x15   : > { %250 = vperm.xlu0 %554, %v246_v3  }
  0x19   : > { %357 = vperm.xlu0 %554, %v354_v4  }
  0x83   : > { %v236_v9 = vpop.permute.xlu0 %235 }
  0x84   : > { %v529_v11 = vpack.c.bf16 %v220_v2, %v236_v9 }
  0x86   : > { %531 = vmatprep.subr.msk.bf16.mxu0 %vm627_vm3, %v529_v11 }
  0x87   : > { %534 = vmatpush3.bf16.msk.msra.mxu0 %vm627_vm3, %v529_v11 }
  0x8a   : > { %518 = vmatmul.mubr.msk.f32.vlgmr.msra.gmra.mrb[0].mxu0 %vm258_vm0, %v245_v12 }
  0x94   : > { %v251_v16 = vpop.permute.xlu0 %250 }
  0x98   : > { %v358_v27 = vpop.permute.xlu0 %357 }
 0x15d   : > { %v519_v15 = vpop.f32.mrb[0].mxu0 }
 0x15e   : > { %v331_v17 = vpop.f32.mrb[1].mxu0 }
 0x15f   : > { %v332_v18 = vadd.f32 %v331_v17, %v251_v16 }
 0x161   : > { %v340_v19 = vmax.f32 %v332_v18, 0.0 }
 0x163   : > { %341 = vrot.lane.b32.xlu1 %v340_v19, %s565_s26 }
 0x167   : > { %344 = vrot.lane.b32.xlu1 %v340_v19, %s570_s8 }
 0x16b   : > { %255 = vperm.xlu1 %555, %v247_v20  }
 0x1d5   : > { %v342_v21 = vpop.permute.xlu1 %341 }
 0x1d6   : > { %v536_v23 = vpack.c.bf16 %v340_v19, %v342_v21 }
 0x1d8   : > { %538 = vmatpush3.bf16.msk.msra.mxu1 %vm627_vm3, %v536_v23 }
 0x1d9   : > { %524 = vmatprep.subr.mxu1 %v569_v14  ;;  %v345_v25 = vpop.permute.xlu1 %344 }
 0x1dc   : > { %525 = vmatpush3.msk.msra.mxu1 %vm348_vm5, %v345_v25 }
 0x1dd   : > { %527 = vmatmul.mubr.msk.f32.vlgmr.msra.gmra.mrb[0].mxu1 %vm360_vm6, %v353_v24 }
 0x1ea   : > { %v256_v26 = vpop.permute.xlu1 %255 }
 0x1eb   : > { %v337_v29 = vadd.f32 %v519_v15, %v256_v26 }
 0x2b0   : > { %v430_v28 = vpop.f32.mrb[0].mxu1 }
 0x2b1   : > { %v431_v30 = vadd.f32 %v430_v28, %v358_v27  ;;  %v528_v31 = vpop.f32.mrb[1].mxu1 }
 0x2b3   : > { %v434_v32 = vadd.f32 %v431_v30, %v337_v29 }
 0x2b5   : > { %v435_v33 = vmax.f32 %v434_v32, 0.0 }
 0x2b7   : > { %436 = vst [vmem:[%s219_s15] sm:$0xff] %v435_v33 }
 0x2b8 PF: > { %s15_s18 = sadd.s32 1, %s562_s18  }
 0x2b9   : > { %p12_p4 = scmp.ge.s32.totalorder %s15_s18, 4  }
 0x2bb   :  { %14 = sbr.rel (!%p12_p4) target bundleno = 1 (0x1), region = 70 }

</bundles_post_ra>
